<compile_context>
chip_gen: v7x
topology: tpu7x:2x2x1
jax: 0.10.0
libtpu: 0.0.40
codegen_flags: <defaults>
</compile_context>

<pallas_src>
import functools

import jax
import jax.numpy as jnp
from jax.experimental import pallas as pl
from jax.experimental.pallas import tpu as pltpu


# ---------------------------------------------------------------------------
# Kernels
# ---------------------------------------------------------------------------
def _matmul_kernel_single_k(a_ref, b_ref, o_ref, *, activate):
    """out = (relu)(a @ b) when the whole K dimension fits in one block.

    Grid = (M_tiles, N_tiles); both axes 'parallel' (megacore shardable),
    no accumulator scratch, each output tile written exactly once.
    """
    acc = jnp.dot(a_ref[...], b_ref[...], preferred_element_type=jnp.float32)
    if activate:
        acc = jnp.maximum(acc, 0.0)
    o_ref[...] = acc.astype(o_ref.dtype)


def _matmul_kernel_acc(a_ref, b_ref, o_ref, acc_ref, *, activate):
    """out = (relu)(a @ b) with a K-reduction grid axis.

    Grid = (M_tiles, N_tiles, K_tiles); K is the last, 'arbitrary' axis so the
    f32 VMEM accumulator persists across it.
    """
    k = pl.program_id(2)

    @pl.when(k == 0)
    def _():
        acc_ref[...] = jnp.zeros_like(acc_ref)

    acc_ref[...] += jnp.dot(
        a_ref[...], b_ref[...], preferred_element_type=jnp.float32
    )

    @pl.when(k == pl.num_programs(2) - 1)
    def _():
        out = acc_ref[...]
        if activate:
            out = jnp.maximum(out, 0.0)
        o_ref[...] = out.astype(o_ref.dtype)


# ---------------------------------------------------------------------------
# Tiled matmul wrapper
# ---------------------------------------------------------------------------
_TM_PREF = 256           # multiple of the 256-wide MXU on v6e/v7x (and of 8)
_TN_PREF = 512           # lane-dense output stores (>= 4 vregs wide)
_TK_PREF = 512           # reduction tile when K cannot be collapsed
_TK_COLLAPSE_MAX = 2048  # collapse the K grid axis when K <= this


def _round_up(x, m):
    return ((x + m - 1) // m) * m


def _pick_tile(dim, preferred):
    # Full-extent blocks are always legal (no (8,128) constraint when the
    # block equals the array dim) and avoid padding for small dims.
    return dim if dim <= preferred else preferred


def _pallas_matmul(a, b, *, activate=False, out_dtype=jnp.float32,
                   compute_dtype=jnp.bfloat16, tm=None, tn=None, tk=None):
    """(relu)(a @ b) via a Pallas TPU kernel.

    a: (M, K), b: (K, N) -> (M, N) in `out_dtype`. Inputs are cast to
    `compute_dtype` for MXU throughput; accumulation is always f32.
    """
    M, K = a.shape
    K2, N = b.shape
    assert K == K2, f"inner dims mismatch: {K} vs {K2}"

    a = a.astype(compute_dtype)
    b = b.astype(compute_dtype)

    tm = tm or _pick_tile(M, _TM_PREF)
    tn = tn or _pick_tile(N, _TN_PREF)
    tk = tk or (K if K <= _TK_COLLAPSE_MAX else _TK_PREF)

    # Zero-pad to tile multiples so partial blocks never read OOB garbage
    # (zeros are neutral for the matmul and for relu; padding is sliced off).
    Mp, Kp, Np = _round_up(M, tm), _round_up(K, tk), _round_up(N, tn)
    if (Mp, Kp) != (M, K):
        a = jnp.pad(a, ((0, Mp - M), (0, Kp - K)))
    if (Kp, Np) != (K, N):
        b = jnp.pad(b, ((0, Kp - K), (0, Np - N)))

    grid_m, grid_n, grid_k = Mp // tm, Np // tn, Kp // tk

    itemsize_in = jnp.dtype(compute_dtype).itemsize
    itemsize_out = jnp.dtype(out_dtype).itemsize
    cost = pl.CostEstimate(
        flops=2 * M * N * K,
        transcendentals=0,
        bytes_accessed=(M * K + K * N) * itemsize_in + M * N * itemsize_out,
    )

    if grid_k == 1:
        # Common GCN case: K (in_features / hidden) fits in one block.
        out_p = pl.pallas_call(
            functools.partial(_matmul_kernel_single_k, activate=activate),
            out_shape=jax.ShapeDtypeStruct((Mp, Np), out_dtype),
            grid_spec=pltpu.PrefetchScalarGridSpec(
                num_scalar_prefetch=0,
                grid=(grid_m, grid_n),
                in_specs=[
                    # a(i) block index is constant across j -> stays resident
                    # while sweeping the N tiles (no re-DMA).
                    pl.BlockSpec((tm, Kp), lambda i, j: (i, 0)),
                    pl.BlockSpec((Kp, tn), lambda i, j: (0, j)),
                ],
                out_specs=pl.BlockSpec((tm, tn), lambda i, j: (i, j)),
            ),
            compiler_params=pltpu.CompilerParams(
                dimension_semantics=("parallel", "parallel")),
            cost_estimate=cost,
        )(a, b)
    else:
        out_p = pl.pallas_call(
            functools.partial(_matmul_kernel_acc, activate=activate),
            out_shape=jax.ShapeDtypeStruct((Mp, Np), out_dtype),
            grid_spec=pltpu.PrefetchScalarGridSpec(
                num_scalar_prefetch=0,
                grid=(grid_m, grid_n, grid_k),
                in_specs=[
                    pl.BlockSpec((tm, tk), lambda i, j, k: (i, k)),
                    pl.BlockSpec((tk, tn), lambda i, j, k: (k, j)),
                ],
                out_specs=pl.BlockSpec((tm, tn), lambda i, j, k: (i, j)),
                scratch_shapes=[pltpu.VMEM((tm, tn), jnp.float32)],
            ),
            compiler_params=pltpu.CompilerParams(
                dimension_semantics=("parallel", "parallel", "arbitrary")),
            cost_estimate=cost,
        )(a, b)

    if (Mp, Np) != (M, N):
        out_p = out_p[:M, :N]
    return out_p


# ---------------------------------------------------------------------------
# GraphConvolutionSparse forward
# ---------------------------------------------------------------------------
@functools.partial(
    jax.jit, static_argnames=("dropout", "training", "compute_dtype"))
def graph_conv_sparse_forward(x, adj, weight, *, dropout=0.0, training=False,
                              rng_key=None, compute_dtype=jnp.bfloat16):
    """relu(adj @ (dropout(x) @ W)) — forward of GraphConvolutionSparse.

    x: (M, in_features), adj: (M, M) dense adjacency, weight: (in, out).
    """
    if training and dropout > 0.0:
        # Inverted dropout, matching F.dropout(input, p, training=True).
        # Cheap elementwise pre-pass, not MXU work -> plain JAX.
        keep = 1.0 - dropout
        mask = jax.random.bernoulli(rng_key, keep, x.shape)
        x = jnp.where(mask, x / keep, 0.0).astype(x.dtype)

    # support = x @ W   (kept in compute_dtype to halve HBM traffic between
    # the two matmuls; the second matmul accumulates in f32 anyway).
    support = _pallas_matmul(
        x, weight, activate=False,
        out_dtype=compute_dtype, compute_dtype=compute_dtype)

    # output = relu(adj @ support)   (relu fused into the kernel epilogue).
    output = _pallas_matmul(
        adj, support, activate=True,
        out_dtype=jnp.float32, compute_dtype=compute_dtype)
    return output


def xavier_uniform(key, shape, dtype=jnp.float32):
    """Matches torch.nn.init.xavier_uniform_ (gain=1)."""
    fan_in, fan_out = shape[0], shape[1]
    limit = jnp.sqrt(6.0 / (fan_in + fan_out))
    return jax.random.uniform(key, shape, dtype, minval=-limit, maxval=limit)


if __name__ == "__main__":
    n_nodes, in_features, out_features = 64, 32, 32

    key = jax.random.PRNGKey(0)
    k_x, k_w, k_a = jax.random.split(key, 3)

    # Node features and xavier-initialized weight (no bias in this module).
    x = jax.random.normal(k_x, (n_nodes, in_features), dtype=jnp.float32)
    weight = xavier_uniform(k_w, (in_features, out_features))

    # Symmetrically-normalized adjacency with self-loops (dense stand-in for
    # the torch sparse tensor fed to torch.spmm).
    a = (jax.random.uniform(k_a, (n_nodes, n_nodes)) < 0.1).astype(jnp.float32)
    a = jnp.maximum(a, a.T) + jnp.eye(n_nodes, dtype=jnp.float32)
    d_inv_sqrt = 1.0 / jnp.sqrt(a.sum(axis=1))
    adj = a * d_inv_sqrt[:, None] * d_inv_sqrt[None, :]

    # Reference in plain JAX (f32): relu(adj @ (x @ W)), dropout=0 / eval.
    ref = jnp.maximum(adj @ (x @ weight), 0.0)

    # Exact-ish check: f32 compute path through the same Pallas kernels.
    out_f32 = graph_conv_sparse_forward(
        x, adj, weight, compute_dtype=jnp.float32)
    out_f32 = jax.block_until_ready(out_f32)
    assert out_f32.shape == (n_nodes, out_features)
    assert jnp.allclose(out_f32, ref, atol=1e-4, rtol=1e-4), \
        "f32 path mismatch vs reference"

    # Default bf16-MXU / f32-accumulate fast path (looser tolerance).
    out_bf16 = graph_conv_sparse_forward(x, adj, weight)
    out_bf16 = jax.block_until_ready(out_bf16)
    assert out_bf16.shape == (n_nodes, out_features)
    assert jnp.allclose(out_bf16, ref, atol=3e-2, rtol=3e-2), \
        "bf16 path mismatch vs reference"

    print("KERNEL_OK")
</pallas_src>

<mosaic_0001>
module attributes {stable_mosaic.version = 11 : i64} {
  func.func @_matmul_kernel_single_k(%arg0: i32, %arg1: i32, %arg2: memref<64x32xf32, #tpu.memory_space<vmem>>, %arg3: memref<32x32xf32, #tpu.memory_space<vmem>>, %arg4: memref<64x32xf32, #tpu.memory_space<vmem>>) attributes {dimension_semantics = [#tpu.dimension_semantics<parallel>, #tpu.dimension_semantics<parallel>], iteration_bounds = array<i64: 1, 1>, scalar_prefetch = 0 : i64, scratch_operands = 0 : i64, tpu.core_type = #tpu.core_type<tc>, window_params = [{transform_indices = @transform_0, window_bounds = array<i64: 64, 32>}, {transform_indices = @transform_1, window_bounds = array<i64: 32, 32>}, {transform_indices = @transform_2, window_bounds = array<i64: 64, 32>}]} {
    %c0 = arith.constant 0 : index
    %c0_0 = arith.constant 0 : index
    %0 = vector.load %arg2[%c0, %c0_0] : memref<64x32xf32, #tpu.memory_space<vmem>>, vector<64x32xf32>
    %c0_1 = arith.constant 0 : index
    %c0_2 = arith.constant 0 : index
    %1 = vector.load %arg3[%c0_1, %c0_2] : memref<32x32xf32, #tpu.memory_space<vmem>>, vector<32x32xf32>
    %cst = arith.constant dense<0.000000e+00> : vector<64x32xf32>
    %2 = tpu.matmul %0, %1, %cst {dimension_numbers = #tpu.dot_dimension_numbers<[1], [0], [0], [1], [0, 0, 1, 1], [], []>} : vector<64x32xf32>, vector<32x32xf32>, vector<64x32xf32> -> vector<64x32xf32>
    %c0_3 = arith.constant 0 : index
    %c0_4 = arith.constant 0 : index
    %3 = vector.load %arg4[%c0_3, %c0_4] : memref<64x32xf32, #tpu.memory_space<vmem>>, vector<64x32xf32>
    tpu.vector_store %arg4[%c0_3, %c0_4], %2 {strides = array<i32>} : memref<64x32xf32, #tpu.memory_space<vmem>>, vector<64x32xf32>,
    return
  }
  func.func @transform_0(%arg0: i32, %arg1: i32) -> (i32, i32) {
    %c0_i32 = arith.constant 0 : i32
    %c0_i32_0 = arith.constant 0 : i32
    return %arg0, %c0_i32 : i32, i32
  }
  func.func @transform_1(%arg0: i32, %arg1: i32) -> (i32, i32) {
    %c0_i32 = arith.constant 0 : i32
    %c0_i32_0 = arith.constant 0 : i32
    return %c0_i32, %arg1 : i32, i32
  }
  func.func @transform_2(%arg0: i32, %arg1: i32) -> (i32, i32) {
    %c0_i32 = arith.constant 0 : i32
    return %arg0, %arg1 : i32, i32
  }
}

module attributes {stable_mosaic.version = 11 : i64} {
  func.func @_matmul_kernel_single_k(%arg0: i32, %arg1: i32, %arg2: memref<64x64xf32, #tpu.memory_space<vmem>>, %arg3: memref<64x32xf32, #tpu.memory_space<vmem>>, %arg4: memref<64x32xf32, #tpu.memory_space<vmem>>) attributes {dimension_semantics = [#tpu.dimension_semantics<parallel>, #tpu.dimension_semantics<parallel>], iteration_bounds = array<i64: 1, 1>, scalar_prefetch = 0 : i64, scratch_operands = 0 : i64, tpu.core_type = #tpu.core_type<tc>, window_params = [{transform_indices = @transform_0, window_bounds = array<i64: 64, 64>}, {transform_indices = @transform_1, window_bounds = array<i64: 64, 32>}, {transform_indices = @transform_2, window_bounds = array<i64: 64, 32>}]} {
    %c0 = arith.constant 0 : index
    %c0_0 = arith.constant 0 : index
    %0 = vector.load %arg2[%c0, %c0_0] : memref<64x64xf32, #tpu.memory_space<vmem>>, vector<64x64xf32>
    %c0_1 = arith.constant 0 : index
    %c0_2 = arith.constant 0 : index
    %1 = vector.load %arg3[%c0_1, %c0_2] : memref<64x32xf32, #tpu.memory_space<vmem>>, vector<64x32xf32>
    %cst = arith.constant dense<0.000000e+00> : vector<64x32xf32>
    %2 = tpu.matmul %0, %1, %cst {dimension_numbers = #tpu.dot_dimension_numbers<[1], [0], [0], [1], [0, 0, 1, 1], [], []>} : vector<64x64xf32>, vector<64x32xf32>, vector<64x32xf32> -> vector<64x32xf32>
    %cst_3 = arith.constant 0.000000e+00 : f32
    %3 = vector.broadcast %cst_3 : f32 to vector<64x32xf32>
    %4 = arith.maximumf %2, %3 : vector<64x32xf32>
    %c0_4 = arith.constant 0 : index
    %c0_5 = arith.constant 0 : index
    %5 = vector.load %arg4[%c0_4, %c0_5] : memref<64x32xf32, #tpu.memory_space<vmem>>, vector<64x32xf32>
    tpu.vector_store %arg4[%c0_4, %c0_5], %4 {strides = array<i32>} : memref<64x32xf32, #tpu.memory_space<vmem>>, vector<64x32xf32>,
    return
  }
  func.func @transform_0(%arg0: i32, %arg1: i32) -> (i32, i32) {
    %c0_i32 = arith.constant 0 : i32
    %c0_i32_0 = arith.constant 0 : i32
    return %arg0, %c0_i32 : i32, i32
  }
  func.func @transform_1(%arg0: i32, %arg1: i32) -> (i32, i32) {
    %c0_i32 = arith.constant 0 : i32
    %c0_i32_0 = arith.constant 0 : i32
    return %c0_i32, %arg1 : i32, i32
  }
  func.func @transform_2(%arg0: i32, %arg1: i32) -> (i32, i32) {
    %c0_i32 = arith.constant 0 : i32
    return %arg0, %arg1 : i32, i32
  }
}

</mosaic_0001>

<bundles_post_ra>
// kernel: graph_conv_sparse_forward.2
= control target key start
LH: loop header
LB: loop body
LE: loop exit
PB: predicated region body
PF: predicated region fallthrough
CT: control target
= control target key end

     0   :  { %vm23_vm0 = vcmask 261120   ;;  %s308_s1 = inlined_call_operand.vmem [shape: f32[32,32], index: 1, kind: input, shape index: {}]   ;;  %s309_s0 = inlined_call_operand.vmem [shape: f32[64,32], index: 0, kind: input, shape index: {}]   ;;  %s310_s2 = inlined_call_operand.vmem [shape: f32[64,32], index: 2, kind: output, shape index: {}]  }
   0x1   :  { %v19_v0 = vld [vmem:[%s308_s1] sm:$0xff]  ;;  %v20_v1 = vld [vmem:[%s308_s1 + $0x8] sm:$0xff]  ;;  %v21_v2 = vld [vmem:[%s308_s1 + $0x10] sm:$0xff] }
   0x2   :  { %v205_v3 = vpack.c.bf16 %v20_v1, %v19_v0  ;;  %v22_v4 = vld [vmem:[%s308_s1 + $0x18] sm:$0xff]  ;;  %v11_v5 = vld [vmem:[%s309_s0] sm:$0xff]  ;;  %v12_v8 = vld [vmem:[%s309_s0 + $0x8] sm:$0xff] }
   0x3   :  { %v15_v6 = vld [vmem:[%s309_s0 + $0x20] sm:$0xff]  ;;  %v209_v7 = vpack.c.bf16 %v22_v4, %v21_v2  ;;  %193 = vmatprep.mubr.msk.f32.mxu0 %vm23_vm0, %v11_v5  ;;  %v16_v9 = vld [vmem:[%s309_s0 + $0x28] sm:$0xff]  ;;  %v13_v10 = vld [vmem:[%s309_s0 + $0x10] sm:$0xff] }
   0x4   :  { %199 = vmatprep.mubr.msk.f32.mxu1 %vm23_vm0, %v15_v6  ;;  %206 = vmatprep.subr.bf16.mxu0 %v205_v3  ;;  %v17_v11 = vld [vmem:[%s309_s0 + $0x30] sm:$0xff]  ;;  %v14_v12 = vld [vmem:[%s309_s0 + $0x18] sm:$0xff] }
   0x5   :  { %213 = vmatprep.subr.bf16.mxu1 %v205_v3  ;;  %208 = vmatpush3.bf16.msra.mxu0 %v205_v3  ;;  %v18_v13 = vld [vmem:[%s309_s0 + $0x38] sm:$0xff] }
   0x6   :  { %215 = vmatpush3.bf16.msra.mxu1 %v205_v3  ;;  %210 = vmatprep.subr.bf16.mxu0 %v209_v7 }
   0x7   :  { %214 = vmatprep.subr.bf16.mxu1 %v209_v7 }
   0x9   :  { %212 = vmatpush3.bf16.msra.mxu0 %v209_v7 }
   0xa   :  { %216 = vmatpush3.bf16.msra.mxu1 %v209_v7 }
   0xc   :  { %194 = vmatmul.mubr.msk.f32.vlgmr.msra.gmra.mrb[0].mxu0 %vm23_vm0, %v12_v8 }
   0xd   :  { %200 = vmatmul.mubr.msk.f32.vlgmr.msra.gmra.mrb[0].mxu1 %vm23_vm0, %v16_v9  ;;  %196 = vmatprep.mubr.msk.f32.mxu0 %vm23_vm0, %v13_v10 }
   0xe   :  { %202 = vmatprep.mubr.msk.f32.mxu1 %vm23_vm0, %v17_v11 }
  0x10   :  { %197 = vmatmul.mubr.msk.f32.gmra.mrb[2].mxu0 %vm23_vm0, %v14_v12 }
  0x11   :  { %203 = vmatmul.mubr.msk.f32.gmra.mrb[2].mxu1 %vm23_vm0, %v18_v13 }
  0xdf   :  { %v195_v14 = vpop.f32.mrb[0].mxu0 }
  0xe0   :  { %v201_v15 = vpop.f32.mrb[0].mxu1  ;;  %154 = vst.msk [vmem:[%s310_s2 + $0x8] sm:$0xff] %vm23_vm0, %v195_v14  ;;  %v114_v16 = vpop.f32.mrb[1].mxu0 }
  0xe1   :  { %158 = vst.msk [vmem:[%s310_s2 + $0x28] sm:$0xff] %vm23_vm0, %v201_v15  ;;  %v134_v17 = vpop.f32.mrb[1].mxu1  ;;  %153 = vst.msk [vmem:[%s310_s2] sm:$0xff] %vm23_vm0, %v114_v16 }
  0xe2   :  { %157 = vst.msk [vmem:[%s310_s2 + $0x20] sm:$0xff] %vm23_vm0, %v134_v17 }
  0xe3   :  { %v198_v18 = vpop.f32.mrb[2].mxu0 }
  0xe4   :  { %v204_v19 = vpop.f32.mrb[2].mxu1  ;;  %156 = vst.msk [vmem:[%s310_s2 + $0x18] sm:$0xff] %vm23_vm0, %v198_v18  ;;  %v124_v20 = vpop.f32.mrb[3].mxu0 }
  0xe5   :  { %160 = vst.msk [vmem:[%s310_s2 + $0x38] sm:$0xff] %vm23_vm0, %v204_v19  ;;  %v144_v21 = vpop.f32.mrb[3].mxu1  ;;  %155 = vst.msk [vmem:[%s310_s2 + $0x10] sm:$0xff] %vm23_vm0, %v124_v20 }
  0xe6   :  { %159 = vst.msk [vmem:[%s310_s2 + $0x30] sm:$0xff] %vm23_vm0, %v144_v21 }

// kernel: graph_conv_sparse_forward.3
= control target key start
LH: loop header
LB: loop body
LE: loop exit
PB: predicated region body
PF: predicated region fallthrough
CT: control target
= control target key end

     0   :  { %vm27_vm0 = vcmask 523264   ;;  %vm165_vm1 = vcmask 261120   ;;  %s357_s1 = inlined_call_operand.vmem [shape: f32[64,32], index: 1, kind: input, shape index: {}]   ;;  %s358_s0 = inlined_call_operand.vmem [shape: f32[64,64], index: 0, kind: input, shape index: {}]   ;;  %s359_s2 = inlined_call_operand.vmem [shape: f32[64,32], index: 2, kind: output, shape index: {}]  }
   0x1   :  { %v19_v0 = vld [vmem:[%s357_s1] sm:$0xff]  ;;  %v20_v1 = vld [vmem:[%s357_s1 + $0x8] sm:$0xff]  ;;  %v21_v2 = vld [vmem:[%s357_s1 + $0x10] sm:$0xff] }
   0x2   :  { %v230_v3 = vpack.c.bf16 %v20_v1, %v19_v0  ;;  %v22_v4 = vld [vmem:[%s357_s1 + $0x18] sm:$0xff]  ;;  %v23_v6 = vld [vmem:[%s357_s1 + $0x20] sm:$0xff]  ;;  %v24_v7 = vld [vmem:[%s357_s1 + $0x28] sm:$0xff] }
   0x3   :  { %v234_v5 = vpack.c.bf16 %v22_v4, %v21_v2  ;;  %v11_v8 = vld [vmem:[%s358_s0] sm:$0xff]  ;;  %v238_v10 = vpack.c.bf16 %v24_v7, %v23_v6  ;;  %v25_v11 = vld [vmem:[%s357_s1 + $0x30] sm:$0xff]  ;;  %v26_v12 = vld [vmem:[%s357_s1 + $0x38] sm:$0xff] }
   0x4   :  { %231 = vmatprep.subr.bf16.mxu0 %v230_v3  ;;  %246 = vmatprep.subr.bf16.mxu1 %v230_v3  ;;  %v15_v9 = vld [vmem:[%s358_s0 + $0x20] sm:$0xff]  ;;  %v242_v13 = vpack.c.bf16 %v26_v12, %v25_v11  ;;  %v12_v14 = vld [vmem:[%s358_s0 + $0x8] sm:$0xff]  ;;  %v13_v16 = vld [vmem:[%s358_s0 + $0x10] sm:$0xff] }
   0x5   :  { %233 = vmatpush3.bf16.msra.mxu0 %v230_v3  ;;  %250 = vmatpush3.bf16.msra.mxu1 %v230_v3  ;;  %v16_v15 = vld [vmem:[%s358_s0 + $0x28] sm:$0xff]  ;;  %v17_v17 = vld [vmem:[%s358_s0 + $0x30] sm:$0xff]  ;;  %v14_v18 = vld [vmem:[%s358_s0 + $0x18] sm:$0xff] }
   0x6   :  { %235 = vmatprep.subr.bf16.mxu0 %v234_v5  ;;  %247 = vmatprep.subr.bf16.mxu1 %v234_v5  ;;  %v18_v19 = vld [vmem:[%s358_s0 + $0x38] sm:$0xff] }
   0x7   :  { %218 = vmatprep.mubr.msk.f32.mxu0 %vm27_vm0, %v11_v8  ;;  %224 = vmatprep.mubr.msk.f32.mxu1 %vm27_vm0, %v15_v9 }
   0x9   :  { %237 = vmatpush3.bf16.msra.mxu0 %v234_v5  ;;  %251 = vmatpush3.bf16.msra.mxu1 %v234_v5 }
   0xa   :  { %239 = vmatprep.subr.bf16.mxu0 %v238_v10  ;;  %248 = vmatprep.subr.bf16.mxu1 %v238_v10 }
   0xd   :  { %241 = vmatpush3.bf16.msra.mxu0 %v238_v10  ;;  %252 = vmatpush3.bf16.msra.mxu1 %v238_v10 }
   0xe   :  { %243 = vmatprep.subr.bf16.mxu0 %v242_v13  ;;  %249 = vmatprep.subr.bf16.mxu1 %v242_v13 }
  0x11   :  { %245 = vmatpush3.bf16.msra.mxu0 %v242_v13  ;;  %253 = vmatpush3.bf16.msra.mxu1 %v242_v13 }
  0x14   :  { %219 = vmatmul.mubr.msk.f32.vlgmr.msra.gmra.mrb[0].mxu0 %vm27_vm0, %v12_v14  ;;  %225 = vmatmul.mubr.msk.f32.vlgmr.msra.gmra.mrb[0].mxu1 %vm27_vm0, %v16_v15 }
  0x15   :  { %221 = vmatprep.mubr.msk.f32.mxu0 %vm27_vm0, %v13_v16  ;;  %227 = vmatprep.mubr.msk.f32.mxu1 %vm27_vm0, %v17_v17 }
  0x18   :  { %222 = vmatmul.mubr.msk.f32.gmra.mrb[2].mxu0 %vm27_vm0, %v14_v18  ;;  %228 = vmatmul.mubr.msk.f32.gmra.mrb[2].mxu1 %vm27_vm0, %v18_v19 }
  0xe7   :  { %v220_v20 = vpop.f32.mrb[0].mxu0  ;;  %v226_v21 = vpop.f32.mrb[0].mxu1 }
  0xe8   :  { %v158_v22 = vmax.f32 %v220_v20, 0.0  ;;  %v162_v23 = vmax.f32 %v226_v21, 0.0  ;;  %v118_v24 = vpop.f32.mrb[1].mxu0  ;;  %v138_v25 = vpop.f32.mrb[1].mxu1 }
  0xe9   :  { %v157_v26 = vmax.f32 %v118_v24, 0.0  ;;  %v161_v27 = vmax.f32 %v138_v25, 0.0 }
  0xea   :  { %167 = vst.msk [vmem:[%s359_s2 + $0x8] sm:$0xff] %vm165_vm1, %v158_v22  ;;  %171 = vst.msk [vmem:[%s359_s2 + $0x28] sm:$0xff] %vm165_vm1, %v162_v23 }
  0xeb   :  { %166 = vst.msk [vmem:[%s359_s2] sm:$0xff] %vm165_vm1, %v157_v26  ;;  %170 = vst.msk [vmem:[%s359_s2 + $0x20] sm:$0xff] %vm165_vm1, %v161_v27  ;;  %v223_v28 = vpop.f32.mrb[2].mxu0  ;;  %v229_v29 = vpop.f32.mrb[2].mxu1 }
  0xec   :  { %v160_v30 = vmax.f32 %v223_v28, 0.0  ;;  %v164_v31 = vmax.f32 %v229_v29, 0.0  ;;  %v128_v32 = vpop.f32.mrb[3].mxu0  ;;  %v148_v33 = vpop.f32.mrb[3].mxu1 }
  0xed   :  { %v159_v34 = vmax.f32 %v128_v32, 0.0  ;;  %v163_v35 = vmax.f32 %v148_v33, 0.0 }
  0xee   :  { %169 = vst.msk [vmem:[%s359_s2 + $0x18] sm:$0xff] %vm165_vm1, %v160_v30  ;;  %173 = vst.msk [vmem:[%s359_s2 + $0x38] sm:$0xff] %vm165_vm1, %v164_v31 }
  0xef   :  { %168 = vst.msk [vmem:[%s359_s2 + $0x10] sm:$0xff] %vm165_vm1, %v159_v34  ;;  %172 = vst.msk [vmem:[%s359_s2 + $0x30] sm:$0xff] %vm165_vm1, %v163_v35 }

</bundles_post_ra>
